<compile_context>
chip_gen: v6e
topology: v6e:2x2x1
jax: 0.10.0
libtpu: 0.0.40
codegen_flags: <defaults>
</compile_context>

<pallas_src>
import functools

import jax
import jax.numpy as jnp
from jax.experimental import pallas as pl
from jax.experimental.pallas import tpu as pltpu


def _pool_kernel(x_ref, o_ref, stage_ref, *, window: int, stride: int,
                 lt: int, chunk: int, use_staging: bool):
    """Max-pool one (Bn, lt, CDp) output tile.

    x_ref:     (Bn, H_pad, CDp)  full-H input block (revisited across L tiles)
    o_ref:     (Bn, lt,    CDp)  output tile
    stage_ref: (Bn, rows_needed, CDp) VMEM staging buffer (used when L is tiled)
    """
    rows_needed = (lt - 1) * stride + window

    if use_staging:
        # Copy just the rows this tile needs into a scratch buffer so all the
        # strided window reads below use *static* offsets.
        tile = pl.program_id(1)
        base = pl.multiple_of(tile * (lt * stride), 8)
        stage_ref[...] = x_ref[:, pl.ds(base, rows_needed), :]
        src = stage_ref
    else:
        # Single L tile: read directly from the input block (static offsets).
        src = x_ref

    # Statically chunk the tile's output rows to bound live vector values.
    for c0 in range(0, lt, chunk):
        rows = min(chunk, lt - c0)
        r0 = c0 * stride
        hi = (rows - 1) * stride + 1
        # Bulk shifted-max: elementwise max of `window` sublane-strided slabs,
        # each slab covering all `rows` outputs of this chunk at once.
        acc = src[:, r0:r0 + hi:stride, :]
        for w in range(1, window):
            acc = jnp.maximum(acc, src[:, r0 + w:r0 + w + hi:stride, :])
        o_ref[:, c0:c0 + rows, :] = acc


def protein_max_pool(x: jax.Array, window: int, stride: int | None = None,
                     *, block_l: int | None = None) -> jax.Array:
    """Pallas implementation of ProteinMaxPool.forward for (N, H, C, D) input."""
    window = int(window)
    stride = window if stride is None else int(stride)
    N, H, C, D = x.shape
    assert H >= window, "ProteinMaxPool requires H >= window"
    L = (H - window) // stride + 1

    itemsize = jnp.dtype(x.dtype).itemsize
    # Minimum sublane multiple for this dtype (8 f32, 16 bf16, 32 int8).
    sub = max(8, 32 // max(itemsize, 1))

    # ---- lane-dense layout: flatten (C, D) -> C*D and pad to 128 lanes ----
    CD = C * D
    CDp = ((CD + 127) // 128) * 128

    # ---- batch blocking: pack several small sequences per grid step ----
    per_batch_in = H * CDp * itemsize
    Bn = int(max(1, min(N, 8, (2 * 1024 * 1024) // max(per_batch_in, 1))))

    # ---- tile the pooled axis L ----
    row_bytes = Bn * CDp * itemsize
    if block_l is None:
        lt_cap = max(sub, min(512, ((512 * 1024) // row_bytes) // sub * sub))
    else:
        lt_cap = max(sub, (int(block_l) // sub) * sub)
    if L <= lt_cap:
        Lt, num_lt = L, 1
    else:
        Lt, num_lt = lt_cap, pl.cdiv(L, lt_cap)

    rows_needed = (Lt - 1) * stride + window
    # Pad H so the last L tile's (possibly out-of-range) staging read stays in
    # bounds; those rows only feed output rows that Pallas drops anyway.
    H_need = (num_lt * Lt - 1) * stride + window if num_lt > 1 else rows_needed
    H_pad = max(H, H_need)

    x2 = x.reshape(N, H, CD)
    if H_pad > H or CDp > CD:
        x2 = jnp.pad(x2, ((0, 0), (0, H_pad - H), (0, CDp - CD)))

    # In-kernel chunk over output rows: keep each slab value <= ~128 KiB.
    chunk = min(Lt, max(sub, ((128 * 1024) // row_bytes) // sub * sub))

    kernel = functools.partial(
        _pool_kernel, window=window, stride=stride, lt=Lt, chunk=chunk,
        use_staging=(num_lt > 1))

    # VMEM budget: double-buffered input + output blocks + staging scratch,
    # kept comfortably under v7x's 64 MiB physical VMEM.
    in_block_b = Bn * H_pad * CDp * itemsize
    out_block_b = Bn * Lt * CDp * itemsize
    stage_b = Bn * rows_needed * CDp * itemsize
    vmem_limit = int(min(56 * 1024 * 1024,
                         max(32 * 1024 * 1024,
                             3 * (in_block_b + out_block_b + stage_b))))

    cost = pl.CostEstimate(
        flops=N * L * max(window - 1, 1) * CD,
        transcendentals=0,
        bytes_accessed=(N * H * CD + N * L * CD) * itemsize,
    )

    out = pl.pallas_call(
        kernel,
        out_shape=jax.ShapeDtypeStruct((N, L, CDp), x.dtype),
        grid=(pl.cdiv(N, Bn), num_lt),
        in_specs=[pl.BlockSpec((Bn, H_pad, CDp), lambda n, l: (n, 0, 0))],
        out_specs=pl.BlockSpec((Bn, Lt, CDp), lambda n, l: (n, l, 0)),
        scratch_shapes=[pltpu.VMEM((Bn, rows_needed, CDp), x.dtype)],
        compiler_params=pltpu.CompilerParams(
            dimension_semantics=("parallel", "parallel"),
            vmem_limit_bytes=vmem_limit,
        ),
        cost_estimate=cost,
    )(x2)

    # Drop lane padding and restore (N, L, C, D).
    return out[:, :, :CD].reshape(N, L, C, D)


def _reference(x: jax.Array, window: int, stride: int) -> jax.Array:
    """Pure-JAX reference mirroring torch.unfold(1, window, stride).max(dim=4)."""
    N, H, C, D = x.shape
    L = (H - window) // stride + 1
    slabs = jnp.stack(
        [x[:, l * stride:l * stride + window] for l in range(L)], axis=1)
    return jnp.max(slabs, axis=2)


if __name__ == "__main__":
    key = jax.random.PRNGKey(0)
    k1, k2 = jax.random.split(key)

    # Config 1: small shapes (N=2, H=16, C=4, D=32); C*D = 128 is already
    # lane-dense, single L tile, batch-blocked (Bn=2).
    x1 = jax.random.normal(k1, (2, 16, 4, 32), dtype=jnp.float32)
    out1 = jax.block_until_ready(protein_max_pool(x1, window=3, stride=2))
    ref1 = _reference(x1, 3, 2)
    assert out1.shape == ref1.shape == (2, 7, 4, 32)
    assert out1.dtype == x1.dtype
    assert jnp.allclose(out1, ref1), "config 1 mismatch vs reference"

    # Config 2: exercises lane padding (C*D=60 -> 128), overlapping windows
    # (window > stride), the multi-L-tile staging path and a partial last tile.
    x2 = jax.random.normal(k2, (3, 64, 3, 20), dtype=jnp.float32)
    out2 = jax.block_until_ready(
        protein_max_pool(x2, window=5, stride=3, block_l=8))
    ref2 = _reference(x2, 5, 3)
    assert out2.shape == ref2.shape == (3, 20, 3, 20)
    assert out2.dtype == x2.dtype
    assert jnp.allclose(out2, ref2), "config 2 mismatch vs reference"

    print("KERNEL_OK")
</pallas_src>

<mosaic_0001>
module attributes {stable_mosaic.version = 11 : i64} {
  func.func @_pool_kernel(%arg0: i32, %arg1: i32, %arg2: memref<2x16x128xf32, #tpu.memory_space<vmem>>, %arg3: memref<2x7x128xf32, #tpu.memory_space<vmem>>, %arg4: memref<2x15x128xf32, #tpu.memory_space<vmem>>) attributes {dimension_semantics = [#tpu.dimension_semantics<parallel>, #tpu.dimension_semantics<parallel>], iteration_bounds = array<i64: 1, 1>, scalar_prefetch = 0 : i64, scratch_operands = 1 : i64, tpu.core_type = #tpu.core_type<tc>, window_params = [{transform_indices = @transform_0, window_bounds = array<i64: 2, 16, 128>}, {transform_indices = @transform_1, window_bounds = array<i64: 2, 7, 128>}]} {
    %c0 = arith.constant 0 : index
    %c0_0 = arith.constant 0 : index
    %c0_1 = arith.constant 0 : index
    %0 = tpu.strided_load %arg2[%c0, %c0_0, %c0_1] {strides = array<i32: 1, 2, 1>} : memref<2x16x128xf32, #tpu.memory_space<vmem>>, vector<2x7x128xf32>
    %c0_2 = arith.constant 0 : index
    %c1 = arith.constant 1 : index
    %c0_3 = arith.constant 0 : index
    %1 = tpu.strided_load %arg2[%c0_2, %c1, %c0_3] {strides = array<i32: 1, 2, 1>} : memref<2x16x128xf32, #tpu.memory_space<vmem>>, vector<2x7x128xf32>
    %2 = arith.maximumf %0, %1 : vector<2x7x128xf32>
    %c0_4 = arith.constant 0 : index
    %c2 = arith.constant 2 : index
    %c0_5 = arith.constant 0 : index
    %3 = tpu.strided_load %arg2[%c0_4, %c2, %c0_5] {strides = array<i32: 1, 2, 1>} : memref<2x16x128xf32, #tpu.memory_space<vmem>>, vector<2x7x128xf32>
    %4 = arith.maximumf %2, %3 : vector<2x7x128xf32>
    %c0_6 = arith.constant 0 : index
    %c0_7 = arith.constant 0 : index
    %c0_8 = arith.constant 0 : index
    %5 = vector.load %arg3[%c0_6, %c0_7, %c0_8] : memref<2x7x128xf32, #tpu.memory_space<vmem>>, vector<2x7x128xf32>
    tpu.vector_store %arg3[%c0_6, %c0_7, %c0_8], %4 {strides = array<i32>} : memref<2x7x128xf32, #tpu.memory_space<vmem>>, vector<2x7x128xf32>,
    return
  }
  func.func @transform_0(%arg0: i32, %arg1: i32) -> (i32, i32, i32) {
    %c0_i32 = arith.constant 0 : i32
    %c0_i32_0 = arith.constant 0 : i32
    %c0_i32_1 = arith.constant 0 : i32
    return %arg0, %c0_i32, %c0_i32_0 : i32, i32, i32
  }
  func.func @transform_1(%arg0: i32, %arg1: i32) -> (i32, i32, i32) {
    %c0_i32 = arith.constant 0 : i32
    %c0_i32_0 = arith.constant 0 : i32
    return %arg0, %arg1, %c0_i32 : i32, i32, i32
  }
}

</mosaic_0001>

<bundles_post_ra>
// kernel: tpu_custom_call.1
= control target key start
LH: loop header
LB: loop body
LE: loop exit
PB: predicated region body
PF: predicated region fallthrough
CT: control target
= control target key end

     0   :  { %6 = vsyncpa [#allocation4], 0  ;;  %s69_s6 = smov [#allocation3]   ;;  %s91_s0 = inlined_call_operand.hbm [shape: f32[2,16,128], index: 0, kind: input, shape index: {}]   ;;  %s92_s1 = inlined_call_operand.vmem [shape: f32[2,7,128], index: 1, kind: output, shape index: {}]  }
   0x1   :  { %s12_s7 = sshll.u32 %s69_s6, 4  ;;  %s13_s7 = int_to_ptr.vmem [resolvable:$true] %s12_s7 }
   0x2   :  { %s55_s8 = scalar_lea.vmem %s13_s7, 512  ;;  %p60_p1 = scmp.lt.s32.totalorder %s13_s7, %s13_s7 }
   0x3   :  { %p56_p0 = scmp.ne.s32.totalorder %s13_s7, %s55_s8  ;;  %p61_p2 = scmp.lt.s32.totalorder %s55_s8, %s55_s8 }
   0x5   :  { %p62_p3 = por %p61_p2, %p60_p1 }
   0x7   :  { %p63_p4 = pnand %p62_p3, %p56_p0 }
   0x9   :  { %66 = shalt.err (!%p63_p4)
}
   0xa   :  { %s70_s9 = smov 128   ;;  %s71_s10 = smov 8  }
   0xb   :  { %18 = dma.hbm_to_vmem [thread:$0]  %s91_s0, 512, %s13_s7, [#allocation4], %s70_s9, %s70_s9, %s71_s10  }
   0xc   :  { %67 = dma.done.wait [#allocation4], 512  }
   0xd   :  { %68 = vsyncadd [#allocation4], 4294966784  ;;  %v22_v0 = vld [vmem:[#allocation3] ss:$2 sm:$0x7f] }
   0xe   :  { %v26_v1 = vld [vmem:[#allocation3 + $0x1] ss:$2 sm:$0x7f]  ;;  %v32_v3 = vld [vmem:[#allocation3 + $0x2] ss:$2 sm:$0x7f] }
   0xf   :  { %v29_v2 = vmax.f32 %v22_v0, %v26_v1  ;;  %v24_v4 = vld [vmem:[#allocation3 + $0x10] ss:$2 sm:$0x7f]  ;;  %v28_v5 = vld [vmem:[#allocation3 + $0x11] ss:$2 sm:$0x7f] }
  0x10   :  { %v34_v6 = vld [vmem:[#allocation3 + $0x12] ss:$2 sm:$0x7f]  ;;  %v30_v8 = vmax.f32 %v24_v4, %v28_v5 }
  0x11   :  { %v35_v7 = vmax.f32 %v29_v2, %v32_v3 }
  0x12   :  { %v36_v9 = vmax.f32 %v30_v8, %v34_v6 }
  0x13   :  { %37 = vst [vmem:[%s92_s1] sm:$0x7f] %v35_v7 }
  0x14   :  { %38 = vst [vmem:[%s92_s1 + $0x8] sm:$0x7f] %v36_v9 }
  0x15   :  { %43 = vsyncpa [#allocation4], 1 }

</bundles_post_ra>
